<compile_context>
chip_gen: v6e
topology: v6e:2x2x1
jax: 0.10.0
libtpu: 0.0.40
codegen_flags: <defaults>
</compile_context>

<pallas_src>
import jax
import jax.numpy as jnp
from jax.experimental import pallas as pl
from jax.experimental.pallas import tpu as pltpu


def _identity_kernel(obs_ref, out_ref):
    # Pure element copy of the current VMEM tile.
    out_ref[...] = obs_ref[...]


def _pick_block_rows(batch, feat, itemsize):
    """Choose the batch-tile height.

    - full-array block if the whole batch fits (always legal),
    - otherwise a dtype-aware multiple of the sublane packing (8 rows for f32,
      16 for bf16, 32 for int8/fp8), as large as possible up to 1024 rows,
      capped so one block stays <= ~4 MiB (in+out double-buffered ~16 MiB).
    """
    mult = 8 * max(1, 4 // max(itemsize, 1))          # 8 / 16 / 32 rows
    max_block_bytes = 4 * 1024 * 1024
    rows_cap = max(mult, max_block_bytes // max(feat * itemsize, 1))
    rows_cap = max(mult, (rows_cap // mult) * mult)   # round down to multiple
    block_rows = min(1024, rows_cap)
    if batch <= block_rows:
        return batch                                  # single full-extent block
    return max(mult, (block_rows // mult) * mult)


def _identity_copy_pallas(obs, *, alias_input_output=False):
    """Route obs through a Pallas VMEM copy kernel (out = obs)."""
    assert obs.ndim == 2, "IdentityEncoder expects [batch, feature_dim] inputs"
    B, F = obs.shape
    itemsize = jnp.dtype(obs.dtype).itemsize
    block_rows = _pick_block_rows(B, F, itemsize)
    grid = (pl.cdiv(B, block_rows),)                  # ragged last block is masked

    extra = {}
    if alias_input_output:
        # Only beneficial if the caller actually donates obs; otherwise XLA
        # inserts a defensive copy, so this is opt-in.
        extra["input_output_aliases"] = {0: 0}

    return pl.pallas_call(
        _identity_kernel,
        out_shape=jax.ShapeDtypeStruct((B, F), obs.dtype),
        grid=grid,
        in_specs=[pl.BlockSpec((block_rows, F), lambda i: (i, 0))],
        out_specs=pl.BlockSpec((block_rows, F), lambda i: (i, 0)),
        compiler_params=pltpu.CompilerParams(
            dimension_semantics=("parallel",),
            vmem_limit_bytes=32 * 1024 * 1024,
        ),
        **extra,
    )(obs)


def identity_encoder_forward(obs, *, min_bytes_for_kernel=1 << 20,
                             alias_input_output=False):
    """Identity encoder forward: returns obs unchanged (same shape/dtype).

    Inputs smaller than `min_bytes_for_kernel` skip the kernel entirely
    (identity requires no on-chip op); larger inputs go through the Pallas
    copy so the op can later be fused with a real encoder.
    """
    nbytes = obs.size * jnp.dtype(obs.dtype).itemsize
    if nbytes < min_bytes_for_kernel:
        return obs
    return _identity_copy_pallas(obs, alias_input_output=alias_input_output)


class IdentityEncoder:
    """JAX/Pallas port of seer_maniskill.encoder2.IdentityEncoder."""

    def __init__(self, obs_shape, feature_dim, num_layers, num_filters, *args):
        assert len(obs_shape) == 1
        self.feature_dim = obs_shape[0]
        # No parameters — the module has none.

    def forward(self, obs, detach=False):
        # `detach` is a no-op in a functional JAX setting.
        return identity_encoder_forward(obs)

    def copy_conv_weights_from(self, source):
        pass

    def log(self, L, step, log_freq):
        pass


if __name__ == "__main__":
    key = jax.random.PRNGKey(0)
    batch, obs_dim = 2, 32  # small flat-state shapes
    obs = jax.random.normal(key, (batch, obs_dim), dtype=jnp.float32)

    enc = IdentityEncoder((obs_dim,), feature_dim=50, num_layers=4, num_filters=32)

    # Production path: tiny input -> zero-cost bypass (no kernel launch).
    out_fast = jax.block_until_ready(enc.forward(obs))
    assert out_fast.shape == obs.shape and out_fast.dtype == obs.dtype
    assert bool(jnp.all(out_fast == obs))

    # Exercise the Pallas kernel path once (force dispatch regardless of size).
    out_kernel = jax.block_until_ready(
        identity_encoder_forward(obs, min_bytes_for_kernel=0))
    assert out_kernel.shape == obs.shape and out_kernel.dtype == obs.dtype
    assert bool(jnp.all(out_kernel == obs))

    print("KERNEL_OK")
</pallas_src>

<mosaic_0001>
module attributes {stable_mosaic.version = 11 : i64} {
  func.func @_identity_kernel(%arg0: i32, %arg1: memref<2x32xf32, #tpu.memory_space<vmem>>, %arg2: memref<2x32xf32, #tpu.memory_space<vmem>>) attributes {dimension_semantics = [#tpu.dimension_semantics<parallel>], iteration_bounds = array<i64: 1>, scalar_prefetch = 0 : i64, scratch_operands = 0 : i64, tpu.core_type = #tpu.core_type<tc>, window_params = [{transform_indices = @transform_0, window_bounds = array<i64: 2, 32>}, {transform_indices = @transform_1, window_bounds = array<i64: 2, 32>}]} {
    %c0 = arith.constant 0 : index
    %c0_0 = arith.constant 0 : index
    %0 = vector.load %arg1[%c0, %c0_0] : memref<2x32xf32, #tpu.memory_space<vmem>>, vector<2x32xf32>
    %c0_1 = arith.constant 0 : index
    %c0_2 = arith.constant 0 : index
    %1 = vector.load %arg2[%c0_1, %c0_2] : memref<2x32xf32, #tpu.memory_space<vmem>>, vector<2x32xf32>
    tpu.vector_store %arg2[%c0_1, %c0_2], %0 {strides = array<i32>} : memref<2x32xf32, #tpu.memory_space<vmem>>, vector<2x32xf32>,
    return
  }
  func.func @transform_0(%arg0: i32) -> (i32, i32) {
    %c0_i32 = arith.constant 0 : i32
    %c0_i32_0 = arith.constant 0 : i32
    return %arg0, %c0_i32 : i32, i32
  }
  func.func @transform_1(%arg0: i32) -> (i32, i32) {
    %c0_i32 = arith.constant 0 : i32
    %c0_i32_0 = arith.constant 0 : i32
    return %arg0, %c0_i32 : i32, i32
  }
}

</mosaic_0001>

<bundles_post_ra>
// kernel: tpu_custom_call.1
= control target key start
LH: loop header
LB: loop body
LE: loop exit
PB: predicated region body
PF: predicated region fallthrough
CT: control target
= control target key end

     0   :  { %6 = vsyncpa [#allocation3], 0  ;;  %s103_s0 = inlined_call_operand.hbm [shape: f32[2,32], index: 0, kind: input, shape index: {}]   ;;  %s104_s1 = inlined_call_operand.hbm [shape: f32[2,32], index: 1, kind: output, shape index: {}]  }
   0x1   :  { %7 = vsyncpa [#allocation4], 0  ;;  %s85_s6 = smov [#allocation2]  }
   0x2   :  { %s14_s7 = sshll.u32 %s85_s6, 4  ;;  %s15_s7 = int_to_ptr.vmem [resolvable:$true] %s14_s7 }
   0x3   :  { %s49_s8 = scalar_lea.vmem %s15_s7, 32  ;;  %p54_p1 = scmp.lt.s32.totalorder %s15_s7, %s15_s7 }
   0x4   :  { %p50_p0 = scmp.ne.s32.totalorder %s15_s7, %s49_s8  ;;  %p55_p2 = scmp.lt.s32.totalorder %s49_s8, %s49_s8 }
   0x6   :  { %p56_p3 = por %p55_p2, %p54_p1 }
   0x8   :  { %p57_p4 = pnand %p56_p3, %p50_p0 }
   0xa   :  { %60 = shalt.err (!%p57_p4)
}
   0xb   :  { %17 = dma.hbm_to_vmem [thread:$0]  %s103_s0, 32, %s15_s7, [#allocation3]  }
   0xc   :  { %81 = dma.done.wait [#allocation3], 32  }
   0xd   :  { %82 = vsyncadd [#allocation3], 4294967264  ;;  %s86_s11 = smov [#allocation5]   ;;  %vm22_vm0 = vcmask 254976   ;;  %v21_v0 = vld [vmem:[#allocation2] sm:$0x3] }
   0xe   :  { %s30_s12 = sshll.u32 %s86_s11, 4  ;;  %23 = vst.msk [vmem:[#allocation5] sm:$0x3] %vm22_vm0, %v21_v0  ;;  %s31_s12 = int_to_ptr.vmem [resolvable:$true] %s30_s12 }
   0xf   :  { %s61_s13 = scalar_lea.vmem %s31_s12, 32  ;;  %p66_p6 = scmp.lt.s32.totalorder %s31_s12, %s31_s12 }
  0x10   :  { %p62_p5 = scmp.ne.s32.totalorder %s31_s12, %s61_s13  ;;  %p67_p7 = scmp.lt.s32.totalorder %s61_s13, %s61_s13 }
  0x12   :  { %p68_p8 = por %p67_p7, %p66_p6 }
  0x14   :  { %p69_p9 = pnand %p68_p8, %p62_p5 }
  0x16   :  { %72 = shalt.err (!%p69_p9)
}
  0x17   :  { %33 = dma.vmem_to_hbm [thread:$0]  %s31_s12, 32, %s104_s1, [#allocation4]  }
  0x18   :  { %83 = dma.done.wait [#allocation4], 32  }
  0x19   :  { %84 = vsyncadd [#allocation4], 4294967264 }
  0x1a   :  { %37 = vsyncpa [#allocation3], 1 }
  0x1b   :  { %38 = vsyncpa [#allocation4], 1 }

</bundles_post_ra>
